<compile_context>
chip_gen: v6e
topology: v6e:2x2x1
jax: 0.10.0
libtpu: 0.0.40
codegen_flags: <defaults>
</compile_context>

<pallas_src>
import functools

import jax
import jax.numpy as jnp
from jax.experimental import pallas as pl
from jax.experimental.pallas import tpu as pltpu

EPS = 1e-5
LANE = 128
VMEM_LIMIT_BYTES = 48 * 1024 * 1024   # explicit scoped-VMEM limit (fits v7x 64 MiB with headroom)
VMEM_BUDGET_BYTES = 40 * 1024 * 1024  # target footprint when auto-picking the M tile


def _round_up(x, m):
    return (x + m - 1) // m * m


# --------------------------------------------------------------------------------------
# kernels
# --------------------------------------------------------------------------------------
def _conv0_shortcut_kernel(p_ref, w_ref, xs_ref, we_ref,
                           y0_ref, ye_ref, s0_ref, q0_ref, se_ref, qe_ref):
    """conv0 tile matmul + shortcut 1x1 matmul; accumulate per-channel sum / sum-of-squares."""
    @pl.when(pl.program_id(0) == 0)
    def _():
        s0_ref[...] = jnp.zeros_like(s0_ref)
        q0_ref[...] = jnp.zeros_like(q0_ref)
        se_ref[...] = jnp.zeros_like(se_ref)
        qe_ref[...] = jnp.zeros_like(qe_ref)

    y0 = jnp.dot(p_ref[...], w_ref[...], preferred_element_type=jnp.float32)
    ye = jnp.dot(xs_ref[...], we_ref[...], preferred_element_type=jnp.float32)
    y0_ref[...] = y0
    ye_ref[...] = ye
    # single pass over the tile: sum and sum-of-squares (mean/var derived outside the kernel)
    s0_ref[...] += jnp.sum(y0, axis=0, keepdims=True)
    q0_ref[...] += jnp.sum(y0 * y0, axis=0, keepdims=True)
    se_ref[...] += jnp.sum(ye, axis=0, keepdims=True)
    qe_ref[...] += jnp.sum(ye * ye, axis=0, keepdims=True)


def _conv_stats_kernel(p_ref, w_ref, y_ref, s_ref, q_ref):
    """conv1 tile matmul + per-channel sum / sum-of-squares accumulation."""
    @pl.when(pl.program_id(0) == 0)
    def _():
        s_ref[...] = jnp.zeros_like(s_ref)
        q_ref[...] = jnp.zeros_like(q_ref)

    y = jnp.dot(p_ref[...], w_ref[...], preferred_element_type=jnp.float32)
    y_ref[...] = y
    s_ref[...] += jnp.sum(y, axis=0, keepdims=True)
    q_ref[...] += jnp.sum(y * y, axis=0, keepdims=True)


def _norm_relu_kernel(y_ref, ss_ref, o_ref):
    """y*scale + shift, relu  (folded BatchNorm affine)."""
    ss = ss_ref[...]
    o = jnp.maximum(y_ref[...] * ss[0:1, :] + ss[1:2, :], 0.0)
    o_ref[...] = o.astype(o_ref.dtype)


def _norm_add_relu_kernel(y1_ref, ye_ref, c_ref, o_ref):
    """relu(scale1*y1 + scalee*ye + (shift1 + shifte))  -- both BNs folded, residual add fused."""
    c = c_ref[...]
    o = y1_ref[...] * c[0:1, :] + ye_ref[...] * c[1:2, :] + c[2:3, :]
    o_ref[...] = jnp.maximum(o, 0.0).astype(o_ref.dtype)


# --------------------------------------------------------------------------------------
# pallas_call wrappers
# --------------------------------------------------------------------------------------
def _compiler_params(semantics):
    return pltpu.CompilerParams(dimension_semantics=semantics,
                                vmem_limit_bytes=VMEM_LIMIT_BYTES)


def _row_spec(tm, cols):
    # per-tile block over the M (output pixel) axis
    return pl.BlockSpec((tm, cols), lambda i: (i, 0))


def _resident_spec(shape):
    # same block for every grid index -> stays resident in VMEM (weights, accumulators, coeffs)
    return pl.BlockSpec(shape, lambda i: (0, 0))


def _call_conv0_shortcut(p0, w0, xs, we, tm):
    mp, k0 = p0.shape
    cp = w0.shape[1]
    cin = xs.shape[1]
    stats = jax.ShapeDtypeStruct((1, cp), jnp.float32)
    return pl.pallas_call(
        _conv0_shortcut_kernel,
        grid=(mp // tm,),
        in_specs=[_row_spec(tm, k0), _resident_spec((k0, cp)),
                  _row_spec(tm, cin), _resident_spec((cin, cp))],
        out_specs=(_row_spec(tm, cp), _row_spec(tm, cp),
                   _resident_spec((1, cp)), _resident_spec((1, cp)),
                   _resident_spec((1, cp)), _resident_spec((1, cp))),
        out_shape=(jax.ShapeDtypeStruct((mp, cp), jnp.float32),
                   jax.ShapeDtypeStruct((mp, cp), jnp.float32),
                   stats, stats, stats, stats),
        compiler_params=_compiler_params(("arbitrary",)),
    )(p0, w0, xs, we)


def _call_conv_stats(p, w, tm):
    mp, k = p.shape
    cp = w.shape[1]
    stats = jax.ShapeDtypeStruct((1, cp), jnp.float32)
    return pl.pallas_call(
        _conv_stats_kernel,
        grid=(mp // tm,),
        in_specs=[_row_spec(tm, k), _resident_spec((k, cp))],
        out_specs=(_row_spec(tm, cp), _resident_spec((1, cp)), _resident_spec((1, cp))),
        out_shape=(jax.ShapeDtypeStruct((mp, cp), jnp.float32), stats, stats),
        compiler_params=_compiler_params(("arbitrary",)),
    )(p, w)


def _call_norm_relu(y, ss, tm, out_dtype):
    mp, cp = y.shape
    return pl.pallas_call(
        _norm_relu_kernel,
        grid=(mp // tm,),
        in_specs=[_row_spec(tm, cp), _resident_spec((2, cp))],
        out_specs=_row_spec(tm, cp),
        out_shape=jax.ShapeDtypeStruct((mp, cp), out_dtype),
        compiler_params=_compiler_params(("parallel",)),
    )(y, ss)


def _call_norm_add_relu(y1, ye, coeffs, tm, out_dtype):
    mp, cp = y1.shape
    return pl.pallas_call(
        _norm_add_relu_kernel,
        grid=(mp // tm,),
        in_specs=[_row_spec(tm, cp), _row_spec(tm, cp), _resident_spec((4, cp))],
        out_specs=_row_spec(tm, cp),
        out_shape=jax.ShapeDtypeStruct((mp, cp), out_dtype),
        compiler_params=_compiler_params(("parallel",)),
    )(y1, ye, coeffs)


# --------------------------------------------------------------------------------------
# wrapper glue (XLA): im2col, weight prep, BN scale/shift folding, tile sizing
# --------------------------------------------------------------------------------------
def _im2col(x_nhwc, k, stride, pad):
    n, h, w, c = x_nhwc.shape
    xp = jnp.pad(x_nhwc, ((0, 0), (pad, pad), (pad, pad), (0, 0)))
    oh = (h + 2 * pad - k) // stride + 1
    ow = (w + 2 * pad - k) // stride + 1
    cols = []
    for kh in range(k):
        for kw in range(k):
            cols.append(xp[:, kh:kh + (oh - 1) * stride + 1:stride,
                           kw:kw + (ow - 1) * stride + 1:stride, :])
    patches = jnp.stack(cols, axis=-2)                 # (N, OH, OW, k*k, C)
    return patches.reshape(n * oh * ow, k * k * c), oh, ow


def prepare_params(params):
    """One-time (outside the per-call path): transpose, channel-pad to 128 lanes, cast to bf16.
    Conv biases are intentionally dropped — with fresh batch statistics they cancel exactly
    inside BatchNorm's (y - mean)."""
    cout, cin = params["w0"].shape[0], params["w0"].shape[1]
    cp = _round_up(cout, LANE)
    pad_c = cp - cout

    def pad_cols(w):
        return jnp.pad(w, ((0, 0), (0, pad_c))).astype(jnp.bfloat16)

    def pad_row(v):
        return jnp.pad(v, (0, pad_c)).astype(jnp.float32).reshape(1, cp)

    w0f = jnp.transpose(params["w0"], (2, 3, 1, 0)).reshape(9 * cin, cout)
    w1f = jnp.transpose(params["w1"], (2, 3, 1, 0)).reshape(9 * cout, cout)
    wef = params["we"][:, :, 0, 0].T                   # (Cin, Cout)
    return {
        "w0": pad_cols(w0f), "w1": pad_cols(w1f), "we": pad_cols(wef),
        "gamma0": pad_row(params["gamma0"]), "beta0": pad_row(params["beta0"]),
        "gammae": pad_row(params["gammae"]), "betae": pad_row(params["betae"]),
        "cin": cin, "cout": cout, "cp": cp,
    }


def _bn_scale_shift(sum_, sumsq, count, gamma, beta):
    mean = sum_ / count
    var = jnp.maximum(sumsq / count - mean * mean, 0.0)
    scale = gamma * jax.lax.rsqrt(var + EPS)
    shift = beta - mean * scale
    return scale, shift


def _pick_block_m(m, k_max, cp, requested):
    """Largest M-tile <= requested that keeps double-buffered tiles under the VMEM budget."""
    tm = max(8, min(_round_up(requested, 8), _round_up(m, 8)))
    while tm > 8:
        footprint = (2 * tm * k_max * 2        # double-buffered bf16 patch tiles
                     + 2 * k_max * cp * 2      # resident bf16 weights
                     + 2 * 2 * tm * cp * 4)    # double-buffered f32 output tiles
        if footprint <= VMEM_BUDGET_BYTES:
            break
        tm = max(8, (tm // 2) // 8 * 8)
    return tm


def res18_downblock_forward(x_nchw, prep, stride, block_m=512):
    s0, s1 = stride
    cin, cout, cp = prep["cin"], prep["cout"], prep["cp"]

    x = jnp.transpose(x_nchw, (0, 2, 3, 1)).astype(jnp.bfloat16)    # NCHW -> NHWC, bf16 MXU inputs
    n = x.shape[0]

    # ---- stage 1: conv0 (3x3, s0, pad 1) + shortcut 1x1 conv (s0), fused, + BN stats ----------
    p0, oh0, ow0 = _im2col(x, 3, s0, 1)
    xs = x[:, ::s0, ::s0, :]
    assert xs.shape[1:3] == (oh0, ow0), "shortcut / conv0 spatial mismatch"
    m0 = n * oh0 * ow0
    xs = xs.reshape(m0, cin)

    k_max = max(p0.shape[1], 9 * cout, cin)
    tm = _pick_block_m(m0, k_max, cp, block_m)
    mp = _round_up(m0, tm)
    p0 = jnp.pad(p0, ((0, mp - m0), (0, 0)))    # zero rows: contribute 0 to sum / sumsq
    xs = jnp.pad(xs, ((0, mp - m0), (0, 0)))

    y0, ye, sum0, sq0, sume, sqe = _call_conv0_shortcut(p0, prep["w0"], xs, prep["we"], tm)

    # ---- bn0(y0) + relu (per-channel scale/shift folded; divisor is the true row count) -------
    scale0, shift0 = _bn_scale_shift(sum0, sq0, m0, prep["gamma0"], prep["beta0"])
    r0 = _call_norm_relu(y0, jnp.concatenate([scale0, shift0], axis=0), tm, jnp.bfloat16)
    r0 = r0[:m0].reshape(n, oh0, ow0, cp)[..., :cout]

    # ---- stage 2: conv1 (3x3, s1, pad 1) + BN stats --------------------------------------------
    p1, oh1, ow1 = _im2col(r0, 3, s1, 1)
    assert (oh1, ow1) == (oh0, ow0), "residual add requires matching spatial dims (stride[1]==1)"
    m1 = n * oh1 * ow1
    p1 = jnp.pad(p1, ((0, mp - m1), (0, 0)))
    y1, sum1, sq1 = _call_conv_stats(p1, prep["w1"], tm)

    # ---- bn0(y1) (bn0 reused, fresh stats) + bn_e(ye) + add + relu, fused ----------------------
    scale1, shift1 = _bn_scale_shift(sum1, sq1, m1, prep["gamma0"], prep["beta0"])
    scalee, shifte = _bn_scale_shift(sume, sqe, m0, prep["gammae"], prep["betae"])
    coeffs = jnp.concatenate([scale1, scalee, shift1 + shifte, jnp.zeros_like(scale1)], axis=0)
    out = _call_norm_add_relu(y1, ye, coeffs, tm, jnp.float32)

    out = out[:m1].reshape(n, oh1, ow1, cp)[..., :cout]
    return jnp.transpose(out, (0, 3, 1, 2))             # NHWC -> NCHW


# --------------------------------------------------------------------------------------
# pure-JAX reference (module semantics, incl. the biases the kernel drops).  Convs use the
# same bf16 MXU input precision (f32 accumulation) as the kernel so the comparison isolates
# implementation differences rather than bf16-vs-f32 rounding.
# --------------------------------------------------------------------------------------
def _ref_forward(x, p, stride, compute_dtype=jnp.bfloat16):
    def conv(x_, w, b, s, pad):
        y = jax.lax.conv_general_dilated(
            x_.astype(compute_dtype), w.astype(compute_dtype), (s, s),
            [(pad, pad), (pad, pad)],
            dimension_numbers=("NCHW", "OIHW", "NCHW"),
            preferred_element_type=jnp.float32)
        return y + b.reshape(1, -1, 1, 1)

    def bn(y, g, be):
        m = jnp.mean(y, axis=(0, 2, 3), keepdims=True)
        v = jnp.mean((y - m) ** 2, axis=(0, 2, 3), keepdims=True)
        return g.reshape(1, -1, 1, 1) * (y - m) * jax.lax.rsqrt(v + EPS) + be.reshape(1, -1, 1, 1)

    s0, s1 = stride
    extra = bn(conv(x, p["we"], p["be"], s0, 0), p["gammae"], p["betae"])
    out = jax.nn.relu(bn(conv(x, p["w0"], p["b0"], s0, 1), p["gamma0"], p["beta0"]))
    out = bn(conv(out, p["w1"], p["b1"], s1, 1), p["gamma0"], p["beta0"])
    return jax.nn.relu(extra + out)


if __name__ == "__main__":
    N, Cin, Cout, H, W = 2, 4, 8, 16, 16
    stride = (2, 1)                      # classic resnet18 down-block

    key = jax.random.PRNGKey(0)
    ks = jax.random.split(key, 12)
    params = {
        "w0": 0.1 * jax.random.normal(ks[0], (Cout, Cin, 3, 3), jnp.float32),
        "b0": 0.1 * jax.random.normal(ks[1], (Cout,), jnp.float32),
        "w1": 0.1 * jax.random.normal(ks[2], (Cout, Cout, 3, 3), jnp.float32),
        "b1": 0.1 * jax.random.normal(ks[3], (Cout,), jnp.float32),
        "we": 0.1 * jax.random.normal(ks[4], (Cout, Cin, 1, 1), jnp.float32),
        "be": 0.1 * jax.random.normal(ks[5], (Cout,), jnp.float32),
        "gamma0": 1.0 + 0.1 * jax.random.normal(ks[6], (Cout,), jnp.float32),
        "beta0": 0.1 * jax.random.normal(ks[7], (Cout,), jnp.float32),
        # bn1 params exist in the module but are never used by forward:
        "gamma1": jnp.ones((Cout,), jnp.float32),
        "beta1": jnp.zeros((Cout,), jnp.float32),
        "gammae": 1.0 + 0.1 * jax.random.normal(ks[8], (Cout,), jnp.float32),
        "betae": 0.1 * jax.random.normal(ks[9], (Cout,), jnp.float32),
    }
    x = jax.random.normal(ks[10], (N, Cin, H, W), jnp.float32)

    prep = prepare_params(params)        # one-time weight transpose / pad / bf16 cast
    # block_m=64 so the toy problem (M=128 rows) actually runs a 2-tile pipelined grid and
    # exercises the cross-tile BN-stat accumulation; default 512 targets real ResNet sizes.
    fwd = jax.jit(functools.partial(
        lambda inp: res18_downblock_forward(inp, prep, stride, block_m=64)))

    y = jax.block_until_ready(fwd(x))
    y_ref = jax.block_until_ready(_ref_forward(x, params, stride))

    assert y.shape == (N, Cout, H // stride[0], W // stride[0]), y.shape
    max_err = float(jnp.max(jnp.abs(y - y_ref)))
    assert jnp.allclose(y, y_ref, atol=2e-2, rtol=2e-2), max_err

    print("KERNEL_OK")
</pallas_src>

<mosaic_0001>
module attributes {stable_mosaic.version = 11 : i64} {
  func.func @_conv0_shortcut_kernel(%arg0: i32, %arg1: memref<64x36xbf16, #tpu.memory_space<vmem>>, %arg2: memref<36x128xbf16, #tpu.memory_space<vmem>>, %arg3: memref<64x4xbf16, #tpu.memory_space<vmem>>, %arg4: memref<4x128xbf16, #tpu.memory_space<vmem>>, %arg5: memref<64x128xf32, #tpu.memory_space<vmem>>, %arg6: memref<64x128xf32, #tpu.memory_space<vmem>>, %arg7: memref<1x128xf32, #tpu.memory_space<vmem>>, %arg8: memref<1x128xf32, #tpu.memory_space<vmem>>, %arg9: memref<1x128xf32, #tpu.memory_space<vmem>>, %arg10: memref<1x128xf32, #tpu.memory_space<vmem>>) attributes {dimension_semantics = [#tpu.dimension_semantics<arbitrary>], iteration_bounds = array<i64: 2>, scalar_prefetch = 0 : i64, scratch_operands = 0 : i64, tpu.core_type = #tpu.core_type<tc>, window_params = [{transform_indices = @transform_0, window_bounds = array<i64: 64, 36>}, {pipeline_mode = #tpu.pipeline_mode<synchronous>, transform_indices = @transform_1, window_bounds = array<i64: 36, 128>}, {transform_indices = @transform_2, window_bounds = array<i64: 64, 4>}, {pipeline_mode = #tpu.pipeline_mode<synchronous>, transform_indices = @transform_3, window_bounds = array<i64: 4, 128>}, {transform_indices = @transform_4, window_bounds = array<i64: 64, 128>}, {transform_indices = @transform_5, window_bounds = array<i64: 64, 128>}, {pipeline_mode = #tpu.pipeline_mode<synchronous>, transform_indices = @transform_6, window_bounds = array<i64: 1, 128>}, {pipeline_mode = #tpu.pipeline_mode<synchronous>, transform_indices = @transform_7, window_bounds = array<i64: 1, 128>}, {pipeline_mode = #tpu.pipeline_mode<synchronous>, transform_indices = @transform_8, window_bounds = array<i64: 1, 128>}, {pipeline_mode = #tpu.pipeline_mode<synchronous>, transform_indices = @transform_9, window_bounds = array<i64: 1, 128>}]} {
    %c0_i32 = arith.constant 0 : i32
    %0 = arith.cmpi eq, %arg0, %c0_i32 : i32
    %1 = arith.extui %0 : i1 to i32
    %c0_i32_0 = arith.constant 0 : i32
    %2 = arith.cmpi ne, %1, %c0_i32_0 : i32
    scf.if %2 {
      %cst_33 = arith.constant 0.000000e+00 : f32
      %33 = vector.broadcast %cst_33 : f32 to vector<1x128xf32>
      %c0_34 = arith.constant 0 : index
      %c0_35 = arith.constant 0 : index
      %34 = vector.load %arg7[%c0_34, %c0_35] : memref<1x128xf32, #tpu.memory_space<vmem>>, vector<1x128xf32>
      tpu.vector_store %arg7[%c0_34, %c0_35], %33 {strides = array<i32>} : memref<1x128xf32, #tpu.memory_space<vmem>>, vector<1x128xf32>,
      %cst_36 = arith.constant 0.000000e+00 : f32
      %35 = vector.broadcast %cst_36 : f32 to vector<1x128xf32>
      %c0_37 = arith.constant 0 : index
      %c0_38 = arith.constant 0 : index
      %36 = vector.load %arg8[%c0_37, %c0_38] : memref<1x128xf32, #tpu.memory_space<vmem>>, vector<1x128xf32>
      tpu.vector_store %arg8[%c0_37, %c0_38], %35 {strides = array<i32>} : memref<1x128xf32, #tpu.memory_space<vmem>>, vector<1x128xf32>,
      %cst_39 = arith.constant 0.000000e+00 : f32
      %37 = vector.broadcast %cst_39 : f32 to vector<1x128xf32>
      %c0_40 = arith.constant 0 : index
      %c0_41 = arith.constant 0 : index
      %38 = vector.load %arg9[%c0_40, %c0_41] : memref<1x128xf32, #tpu.memory_space<vmem>>, vector<1x128xf32>
      tpu.vector_store %arg9[%c0_40, %c0_41], %37 {strides = array<i32>} : memref<1x128xf32, #tpu.memory_space<vmem>>, vector<1x128xf32>,
      %cst_42 = arith.constant 0.000000e+00 : f32
      %39 = vector.broadcast %cst_42 : f32 to vector<1x128xf32>
      %c0_43 = arith.constant 0 : index
      %c0_44 = arith.constant 0 : index
      %40 = vector.load %arg10[%c0_43, %c0_44] : memref<1x128xf32, #tpu.memory_space<vmem>>, vector<1x128xf32>
      tpu.vector_store %arg10[%c0_43, %c0_44], %39 {strides = array<i32>} : memref<1x128xf32, #tpu.memory_space<vmem>>, vector<1x128xf32>,
    } else {
    }
    %c0 = arith.constant 0 : index
    %c0_1 = arith.constant 0 : index
    %3 = vector.load %arg1[%c0, %c0_1] : memref<64x36xbf16, #tpu.memory_space<vmem>>, vector<64x36xbf16>
    %c0_2 = arith.constant 0 : index
    %c0_3 = arith.constant 0 : index
    %4 = vector.load %arg2[%c0_2, %c0_3] : memref<36x128xbf16, #tpu.memory_space<vmem>>, vector<36x128xbf16>
    %cst = arith.constant dense<0.000000e+00> : vector<64x128xf32>
    %5 = tpu.matmul %3, %4, %cst {dimension_numbers = #tpu.dot_dimension_numbers<[1], [0], [0], [1], [0, 0, 1, 1], [], []>} : vector<64x36xbf16>, vector<36x128xbf16>, vector<64x128xf32> -> vector<64x128xf32>
    %c0_4 = arith.constant 0 : index
    %c0_5 = arith.constant 0 : index
    %6 = vector.load %arg3[%c0_4, %c0_5] : memref<64x4xbf16, #tpu.memory_space<vmem>>, vector<64x4xbf16>
    %c0_6 = arith.constant 0 : index
    %c0_7 = arith.constant 0 : index
    %7 = vector.load %arg4[%c0_6, %c0_7] : memref<4x128xbf16, #tpu.memory_space<vmem>>, vector<4x128xbf16>
    %cst_8 = arith.constant dense<0.000000e+00> : vector<64x128xf32>
    %8 = tpu.matmul %6, %7, %cst_8 {dimension_numbers = #tpu.dot_dimension_numbers<[1], [0], [0], [1], [0, 0, 1, 1], [], []>} : vector<64x4xbf16>, vector<4x128xbf16>, vector<64x128xf32> -> vector<64x128xf32>
    %c0_9 = arith.constant 0 : index
    %c0_10 = arith.constant 0 : index
    %9 = vector.load %arg5[%c0_9, %c0_10] : memref<64x128xf32, #tpu.memory_space<vmem>>, vector<64x128xf32>
    tpu.vector_store %arg5[%c0_9, %c0_10], %5 {strides = array<i32>} : memref<64x128xf32, #tpu.memory_space<vmem>>, vector<64x128xf32>,
    %c0_11 = arith.constant 0 : index
    %c0_12 = arith.constant 0 : index
    %10 = vector.load %arg6[%c0_11, %c0_12] : memref<64x128xf32, #tpu.memory_space<vmem>>, vector<64x128xf32>
    tpu.vector_store %arg6[%c0_11, %c0_12], %8 {strides = array<i32>} : memref<64x128xf32, #tpu.memory_space<vmem>>, vector<64x128xf32>,
    %c0_13 = arith.constant 0 : index
    %c0_14 = arith.constant 0 : index
    %11 = vector.load %arg7[%c0_13, %c0_14] : memref<1x128xf32, #tpu.memory_space<vmem>>, vector<1x128xf32>
    %cst_15 = arith.constant dense<0.000000e+00> : vector<128xf32>
    %12 = vector.multi_reduction <add>, %5, %cst_15 [0] : vector<64x128xf32> to vector<128xf32>
    %13 = vector.shape_cast %12 : vector<128xf32> to vector<1x128xf32>
    %14 = arith.addf %11, %13 : vector<1x128xf32>
    %c0_16 = arith.constant 0 : index
    %c0_17 = arith.constant 0 : index
    %15 = vector.load %arg7[%c0_16, %c0_17] : memref<1x128xf32, #tpu.memory_space<vmem>>, vector<1x128xf32>
    tpu.vector_store %arg7[%c0_16, %c0_17], %14 {strides = array<i32>} : memref<1x128xf32, #tpu.memory_space<vmem>>, vector<1x128xf32>,
    %c0_18 = arith.constant 0 : index
    %c0_19 = arith.constant 0 : index
    %16 = vector.load %arg8[%c0_18, %c0_19] : memref<1x128xf32, #tpu.memory_space<vmem>>, vector<1x128xf32>
    %17 = arith.mulf %5, %5 : vector<64x128xf32>
    %cst_20 = arith.constant dense<0.000000e+00> : vector<128xf32>
    %18 = vector.multi_reduction <add>, %17, %cst_20 [0] : vector<64x128xf32> to vector<128xf32>
    %19 = vector.shape_cast %18 : vector<128xf32> to vector<1x128xf32>
    %20 = arith.addf %16, %19 : vector<1x128xf32>
    %c0_21 = arith.constant 0 : index
    %c0_22 = arith.constant 0 : index
    %21 = vector.load %arg8[%c0_21, %c0_22] : memref<1x128xf32, #tpu.memory_space<vmem>>, vector<1x128xf32>
    tpu.vector_store %arg8[%c0_21, %c0_22], %20 {strides = array<i32>} : memref<1x128xf32, #tpu.memory_space<vmem>>, vector<1x128xf32>,
    %c0_23 = arith.constant 0 : index
    %c0_24 = arith.constant 0 : index
    %22 = vector.load %arg9[%c0_23, %c0_24] : memref<1x128xf32, #tpu.memory_space<vmem>>, vector<1x128xf32>
    %cst_25 = arith.constant dense<0.000000e+00> : vector<128xf32>
    %23 = vector.multi_reduction <add>, %8, %cst_25 [0] : vector<64x128xf32> to vector<128xf32>
    %24 = vector.shape_cast %23 : vector<128xf32> to vector<1x128xf32>
    %25 = arith.addf %22, %24 : vector<1x128xf32>
    %c0_26 = arith.constant 0 : index
    %c0_27 = arith.constant 0 : index
    %26 = vector.load %arg9[%c0_26, %c0_27] : memref<1x128xf32, #tpu.memory_space<vmem>>, vector<1x128xf32>
    tpu.vector_store %arg9[%c0_26, %c0_27], %25 {strides = array<i32>} : memref<1x128xf32, #tpu.memory_space<vmem>>, vector<1x128xf32>,
    %c0_28 = arith.constant 0 : index
    %c0_29 = arith.constant 0 : index
    %27 = vector.load %arg10[%c0_28, %c0_29] : memref<1x128xf32, #tpu.memory_space<vmem>>, vector<1x128xf32>
    %28 = arith.mulf %8, %8 : vector<64x128xf32>
    %cst_30 = arith.constant dense<0.000000e+00> : vector<128xf32>
    %29 = vector.multi_reduction <add>, %28, %cst_30 [0] : vector<64x128xf32> to vector<128xf32>
    %30 = vector.shape_cast %29 : vector<128xf32> to vector<1x128xf32>
    %31 = arith.addf %27, %30 : vector<1x128xf32>
    %c0_31 = arith.constant 0 : index
    %c0_32 = arith.constant 0 : index
    %32 = vector.load %arg10[%c0_31, %c0_32] : memref<1x128xf32, #tpu.memory_space<vmem>>, vector<1x128xf32>
    tpu.vector_store %arg10[%c0_31, %c0_32], %31 {strides = array<i32>} : memref<1x128xf32, #tpu.memory_space<vmem>>, vector<1x128xf32>,
    return
  }
  func.func @transform_0(%arg0: i32) -> (i32, i32) {
    %c0_i32 = arith.constant 0 : i32
    %c0_i32_0 = arith.constant 0 : i32
    return %arg0, %c0_i32 : i32, i32
  }
  func.func @transform_1(%arg0: i32) -> (i32, i32) {
    %c0_i32 = arith.constant 0 : i32
    %c0_i32_0 = arith.constant 0 : i32
    %c0_i32_1 = arith.constant 0 : i32
    return %c0_i32, %c0_i32_0 : i32, i32
  }
  func.func @transform_2(%arg0: i32) -> (i32, i32) {
    %c0_i32 = arith.constant 0 : i32
    %c0_i32_0 = arith.constant 0 : i32
    return %arg0, %c0_i32 : i32, i32
  }
  func.func @transform_3(%arg0: i32) -> (i32, i32) {
    %c0_i32 = arith.constant 0 : i32
    %c0_i32_0 = arith.constant 0 : i32
    %c0_i32_1 = arith.constant 0 : i32
    return %c0_i32, %c0_i32_0 : i32, i32
  }
  func.func @transform_4(%arg0: i32) -> (i32, i32) {
    %c0_i32 = arith.constant 0 : i32
    %c0_i32_0 = arith.constant 0 : i32
    return %arg0, %c0_i32 : i32, i32
  }
  func.func @transform_5(%arg0: i32) -> (i32, i32) {
    %c0_i32 = arith.constant 0 : i32
    %c0_i32_0 = arith.constant 0 : i32
    return %arg0, %c0_i32 : i32, i32
  }
  func.func @transform_6(%arg0: i32) -> (i32, i32) {
    %c0_i32 = arith.constant 0 : i32
    %c0_i32_0 = arith.constant 0 : i32
    %c0_i32_1 = arith.constant 0 : i32
    return %c0_i32, %c0_i32_0 : i32, i32
  }
  func.func @transform_7(%arg0: i32) -> (i32, i32) {
    %c0_i32 = arith.constant 0 : i32
    %c0_i32_0 = arith.constant 0 : i32
    %c0_i32_1 = arith.constant 0 : i32
    return %c0_i32, %c0_i32_0 : i32, i32
  }
  func.func @transform_8(%arg0: i32) -> (i32, i32) {
    %c0_i32 = arith.constant 0 : i32
    %c0_i32_0 = arith.constant 0 : i32
    %c0_i32_1 = arith.constant 0 : i32
    return %c0_i32, %c0_i32_0 : i32, i32
  }
  func.func @transform_9(%arg0: i32) -> (i32, i32) {
    %c0_i32 = arith.constant 0 : i32
    %c0_i32_0 = arith.constant 0 : i32
    %c0_i32_1 = arith.constant 0 : i32
    return %c0_i32, %c0_i32_0 : i32, i32
  }
}

module attributes {stable_mosaic.version = 11 : i64} {
  func.func @_norm_relu_kernel(%arg0: i32, %arg1: memref<64x128xf32, #tpu.memory_space<vmem>>, %arg2: memref<2x128xf32, #tpu.memory_space<vmem>>, %arg3: memref<64x128xbf16, #tpu.memory_space<vmem>>) attributes {dimension_semantics = [#tpu.dimension_semantics<parallel>], iteration_bounds = array<i64: 2>, scalar_prefetch = 0 : i64, scratch_operands = 0 : i64, tpu.core_type = #tpu.core_type<tc>, window_params = [{transform_indices = @transform_0, window_bounds = array<i64: 64, 128>}, {pipeline_mode = #tpu.pipeline_mode<synchronous>, transform_indices = @transform_1, window_bounds = array<i64: 2, 128>}, {transform_indices = @transform_2, window_bounds = array<i64: 64, 128>}]} {
    %c0 = arith.constant 0 : index
    %c0_0 = arith.constant 0 : index
    %0 = vector.load %arg2[%c0, %c0_0] : memref<2x128xf32, #tpu.memory_space<vmem>>, vector<2x128xf32>
    %c0_1 = arith.constant 0 : index
    %c0_2 = arith.constant 0 : index
    %1 = vector.load %arg1[%c0_1, %c0_2] : memref<64x128xf32, #tpu.memory_space<vmem>>, vector<64x128xf32>
    %2 = vector.extract_strided_slice %0 {offsets = [0, 0], sizes = [1, 128], strides = [1, 1]} : vector<2x128xf32> to vector<1x128xf32>
    %3 = vector.broadcast %2 : vector<1x128xf32> to vector<64x128xf32>
    %4 = arith.mulf %1, %3 : vector<64x128xf32>
    %5 = vector.extract_strided_slice %0 {offsets = [1, 0], sizes = [1, 128], strides = [1, 1]} : vector<2x128xf32> to vector<1x128xf32>
    %6 = vector.broadcast %5 : vector<1x128xf32> to vector<64x128xf32>
    %7 = arith.addf %4, %6 : vector<64x128xf32>
    %cst = arith.constant 0.000000e+00 : f32
    %8 = vector.broadcast %cst : f32 to vector<64x128xf32>
    %9 = arith.maximumf %7, %8 : vector<64x128xf32>
    %10 = arith.truncf %9 : vector<64x128xf32> to vector<64x128xbf16>
    %c0_3 = arith.constant 0 : index
    %c0_4 = arith.constant 0 : index
    %11 = vector.load %arg3[%c0_3, %c0_4] : memref<64x128xbf16, #tpu.memory_space<vmem>>, vector<64x128xbf16>
    tpu.vector_store %arg3[%c0_3, %c0_4], %10 {strides = array<i32>} : memref<64x128xbf16, #tpu.memory_space<vmem>>, vector<64x128xbf16>,
    return
  }
  func.func @transform_0(%arg0: i32) -> (i32, i32) {
    %c0_i32 = arith.constant 0 : i32
    %c0_i32_0 = arith.constant 0 : i32
    return %arg0, %c0_i32 : i32, i32
  }
  func.func @transform_1(%arg0: i32) -> (i32, i32) {
    %c0_i32 = arith.constant 0 : i32
    %c0_i32_0 = arith.constant 0 : i32
    %c0_i32_1 = arith.constant 0 : i32
    return %c0_i32, %c0_i32_0 : i32, i32
  }
  func.func @transform_2(%arg0: i32) -> (i32, i32) {
    %c0_i32 = arith.constant 0 : i32
    %c0_i32_0 = arith.constant 0 : i32
    return %arg0, %c0_i32 : i32, i32
  }
}

module attributes {stable_mosaic.version = 11 : i64} {
  func.func @_conv_stats_kernel(%arg0: i32, %arg1: memref<64x72xbf16, #tpu.memory_space<vmem>>, %arg2: memref<72x128xbf16, #tpu.memory_space<vmem>>, %arg3: memref<64x128xf32, #tpu.memory_space<vmem>>, %arg4: memref<1x128xf32, #tpu.memory_space<vmem>>, %arg5: memref<1x128xf32, #tpu.memory_space<vmem>>) attributes {dimension_semantics = [#tpu.dimension_semantics<arbitrary>], iteration_bounds = array<i64: 2>, scalar_prefetch = 0 : i64, scratch_operands = 0 : i64, tpu.core_type = #tpu.core_type<tc>, window_params = [{transform_indices = @transform_0, window_bounds = array<i64: 64, 72>}, {pipeline_mode = #tpu.pipeline_mode<synchronous>, transform_indices = @transform_1, window_bounds = array<i64: 72, 128>}, {transform_indices = @transform_2, window_bounds = array<i64: 64, 128>}, {pipeline_mode = #tpu.pipeline_mode<synchronous>, transform_indices = @transform_3, window_bounds = array<i64: 1, 128>}, {pipeline_mode = #tpu.pipeline_mode<synchronous>, transform_indices = @transform_4, window_bounds = array<i64: 1, 128>}]} {
    %c0_i32 = arith.constant 0 : i32
    %0 = arith.cmpi eq, %arg0, %c0_i32 : i32
    %1 = arith.extui %0 : i1 to i32
    %c0_i32_0 = arith.constant 0 : i32
    %2 = arith.cmpi ne, %1, %c0_i32_0 : i32
    scf.if %2 {
      %cst_16 = arith.constant 0.000000e+00 : f32
      %18 = vector.broadcast %cst_16 : f32 to vector<1x128xf32>
      %c0_17 = arith.constant 0 : index
      %c0_18 = arith.constant 0 : index
      %19 = vector.load %arg4[%c0_17, %c0_18] : memref<1x128xf32, #tpu.memory_space<vmem>>, vector<1x128xf32>
      tpu.vector_store %arg4[%c0_17, %c0_18], %18 {strides = array<i32>} : memref<1x128xf32, #tpu.memory_space<vmem>>, vector<1x128xf32>,
      %cst_19 = arith.constant 0.000000e+00 : f32
      %20 = vector.broadcast %cst_19 : f32 to vector<1x128xf32>
      %c0_20 = arith.constant 0 : index
      %c0_21 = arith.constant 0 : index
      %21 = vector.load %arg5[%c0_20, %c0_21] : memref<1x128xf32, #tpu.memory_space<vmem>>, vector<1x128xf32>
      tpu.vector_store %arg5[%c0_20, %c0_21], %20 {strides = array<i32>} : memref<1x128xf32, #tpu.memory_space<vmem>>, vector<1x128xf32>,
    } else {
    }
    %c0 = arith.constant 0 : index
    %c0_1 = arith.constant 0 : index
    %3 = vector.load %arg1[%c0, %c0_1] : memref<64x72xbf16, #tpu.memory_space<vmem>>, vector<64x72xbf16>
    %c0_2 = arith.constant 0 : index
    %c0_3 = arith.constant 0 : index
    %4 = vector.load %arg2[%c0_2, %c0_3] : memref<72x128xbf16, #tpu.memory_space<vmem>>, vector<72x128xbf16>
    %cst = arith.constant dense<0.000000e+00> : vector<64x128xf32>
    %5 = tpu.matmul %3, %4, %cst {dimension_numbers = #tpu.dot_dimension_numbers<[1], [0], [0], [1], [0, 0, 1, 1], [], []>} : vector<64x72xbf16>, vector<72x128xbf16>, vector<64x128xf32> -> vector<64x128xf32>
    %c0_4 = arith.constant 0 : index
    %c0_5 = arith.constant 0 : index
    %6 = vector.load %arg3[%c0_4, %c0_5] : memref<64x128xf32, #tpu.memory_space<vmem>>, vector<64x128xf32>
    tpu.vector_store %arg3[%c0_4, %c0_5], %5 {strides = array<i32>} : memref<64x128xf32, #tpu.memory_space<vmem>>, vector<64x128xf32>,
    %c0_6 = arith.constant 0 : index
    %c0_7 = arith.constant 0 : index
    %7 = vector.load %arg4[%c0_6, %c0_7] : memref<1x128xf32, #tpu.memory_space<vmem>>, vector<1x128xf32>
    %cst_8 = arith.constant dense<0.000000e+00> : vector<128xf32>
    %8 = vector.multi_reduction <add>, %5, %cst_8 [0] : vector<64x128xf32> to vector<128xf32>
    %9 = vector.shape_cast %8 : vector<128xf32> to vector<1x128xf32>
    %10 = arith.addf %7, %9 : vector<1x128xf32>
    %c0_9 = arith.constant 0 : index
    %c0_10 = arith.constant 0 : index
    %11 = vector.load %arg4[%c0_9, %c0_10] : memref<1x128xf32, #tpu.memory_space<vmem>>, vector<1x128xf32>
    tpu.vector_store %arg4[%c0_9, %c0_10], %10 {strides = array<i32>} : memref<1x128xf32, #tpu.memory_space<vmem>>, vector<1x128xf32>,
    %c0_11 = arith.constant 0 : index
    %c0_12 = arith.constant 0 : index
    %12 = vector.load %arg5[%c0_11, %c0_12] : memref<1x128xf32, #tpu.memory_space<vmem>>, vector<1x128xf32>
    %13 = arith.mulf %5, %5 : vector<64x128xf32>
    %cst_13 = arith.constant dense<0.000000e+00> : vector<128xf32>
    %14 = vector.multi_reduction <add>, %13, %cst_13 [0] : vector<64x128xf32> to vector<128xf32>
    %15 = vector.shape_cast %14 : vector<128xf32> to vector<1x128xf32>
    %16 = arith.addf %12, %15 : vector<1x128xf32>
    %c0_14 = arith.constant 0 : index
    %c0_15 = arith.constant 0 : index
    %17 = vector.load %arg5[%c0_14, %c0_15] : memref<1x128xf32, #tpu.memory_space<vmem>>, vector<1x128xf32>
    tpu.vector_store %arg5[%c0_14, %c0_15], %16 {strides = array<i32>} : memref<1x128xf32, #tpu.memory_space<vmem>>, vector<1x128xf32>,
    return
  }
  func.func @transform_0(%arg0: i32) -> (i32, i32) {
    %c0_i32 = arith.constant 0 : i32
    %c0_i32_0 = arith.constant 0 : i32
    return %arg0, %c0_i32 : i32, i32
  }
  func.func @transform_1(%arg0: i32) -> (i32, i32) {
    %c0_i32 = arith.constant 0 : i32
    %c0_i32_0 = arith.constant 0 : i32
    %c0_i32_1 = arith.constant 0 : i32
    return %c0_i32, %c0_i32_0 : i32, i32
  }
  func.func @transform_2(%arg0: i32) -> (i32, i32) {
    %c0_i32 = arith.constant 0 : i32
    %c0_i32_0 = arith.constant 0 : i32
    return %arg0, %c0_i32 : i32, i32
  }
  func.func @transform_3(%arg0: i32) -> (i32, i32) {
    %c0_i32 = arith.constant 0 : i32
    %c0_i32_0 = arith.constant 0 : i32
    %c0_i32_1 = arith.constant 0 : i32
    return %c0_i32, %c0_i32_0 : i32, i32
  }
  func.func @transform_4(%arg0: i32) -> (i32, i32) {
    %c0_i32 = arith.constant 0 : i32
    %c0_i32_0 = arith.constant 0 : i32
    %c0_i32_1 = arith.constant 0 : i32
    return %c0_i32, %c0_i32_0 : i32, i32
  }
}

module attributes {stable_mosaic.version = 11 : i64} {
  func.func @_norm_add_relu_kernel(%arg0: i32, %arg1: memref<64x128xf32, #tpu.memory_space<vmem>>, %arg2: memref<64x128xf32, #tpu.memory_space<vmem>>, %arg3: memref<4x128xf32, #tpu.memory_space<vmem>>, %arg4: memref<64x128xf32, #tpu.memory_space<vmem>>) attributes {dimension_semantics = [#tpu.dimension_semantics<parallel>], iteration_bounds = array<i64: 2>, scalar_prefetch = 0 : i64, scratch_operands = 0 : i64, tpu.core_type = #tpu.core_type<tc>, window_params = [{transform_indices = @transform_0, window_bounds = array<i64: 64, 128>}, {transform_indices = @transform_1, window_bounds = array<i64: 64, 128>}, {pipeline_mode = #tpu.pipeline_mode<synchronous>, transform_indices = @transform_2, window_bounds = array<i64: 4, 128>}, {transform_indices = @transform_3, window_bounds = array<i64: 64, 128>}]} {
    %c0 = arith.constant 0 : index
    %c0_0 = arith.constant 0 : index
    %0 = vector.load %arg3[%c0, %c0_0] : memref<4x128xf32, #tpu.memory_space<vmem>>, vector<4x128xf32>
    %c0_1 = arith.constant 0 : index
    %c0_2 = arith.constant 0 : index
    %1 = vector.load %arg1[%c0_1, %c0_2] : memref<64x128xf32, #tpu.memory_space<vmem>>, vector<64x128xf32>
    %2 = vector.extract_strided_slice %0 {offsets = [0, 0], sizes = [1, 128], strides = [1, 1]} : vector<4x128xf32> to vector<1x128xf32>
    %3 = vector.broadcast %2 : vector<1x128xf32> to vector<64x128xf32>
    %4 = arith.mulf %1, %3 : vector<64x128xf32>
    %c0_3 = arith.constant 0 : index
    %c0_4 = arith.constant 0 : index
    %5 = vector.load %arg2[%c0_3, %c0_4] : memref<64x128xf32, #tpu.memory_space<vmem>>, vector<64x128xf32>
    %6 = vector.extract_strided_slice %0 {offsets = [1, 0], sizes = [1, 128], strides = [1, 1]} : vector<4x128xf32> to vector<1x128xf32>
    %7 = vector.broadcast %6 : vector<1x128xf32> to vector<64x128xf32>
    %8 = arith.mulf %5, %7 : vector<64x128xf32>
    %9 = arith.addf %4, %8 : vector<64x128xf32>
    %10 = vector.extract_strided_slice %0 {offsets = [2, 0], sizes = [1, 128], strides = [1, 1]} : vector<4x128xf32> to vector<1x128xf32>
    %11 = vector.broadcast %10 : vector<1x128xf32> to vector<64x128xf32>
    %12 = arith.addf %9, %11 : vector<64x128xf32>
    %cst = arith.constant 0.000000e+00 : f32
    %13 = vector.broadcast %cst : f32 to vector<64x128xf32>
    %14 = arith.maximumf %12, %13 : vector<64x128xf32>
    %c0_5 = arith.constant 0 : index
    %c0_6 = arith.constant 0 : index
    %15 = vector.load %arg4[%c0_5, %c0_6] : memref<64x128xf32, #tpu.memory_space<vmem>>, vector<64x128xf32>
    tpu.vector_store %arg4[%c0_5, %c0_6], %14 {strides = array<i32>} : memref<64x128xf32, #tpu.memory_space<vmem>>, vector<64x128xf32>,
    return
  }
  func.func @transform_0(%arg0: i32) -> (i32, i32) {
    %c0_i32 = arith.constant 0 : i32
    %c0_i32_0 = arith.constant 0 : i32
    return %arg0, %c0_i32 : i32, i32
  }
  func.func @transform_1(%arg0: i32) -> (i32, i32) {
    %c0_i32 = arith.constant 0 : i32
    %c0_i32_0 = arith.constant 0 : i32
    return %arg0, %c0_i32 : i32, i32
  }
  func.func @transform_2(%arg0: i32) -> (i32, i32) {
    %c0_i32 = arith.constant 0 : i32
    %c0_i32_0 = arith.constant 0 : i32
    %c0_i32_1 = arith.constant 0 : i32
    return %c0_i32, %c0_i32_0 : i32, i32
  }
  func.func @transform_3(%arg0: i32) -> (i32, i32) {
    %c0_i32 = arith.constant 0 : i32
    %c0_i32_0 = arith.constant 0 : i32
    return %arg0, %c0_i32 : i32, i32
  }
}

</mosaic_0001>

<bundles_post_ra>
// kernel: _lambda_.5
= control target key start
LH: loop header
LB: loop body
LE: loop exit
PB: predicated region body
PF: predicated region fallthrough
CT: control target
= control target key end

     0   :  { %s365_s9 = smov 0   ;;  %s389_s0 = inlined_call_operand.vmem [shape: f32[128,128], index: 0, kind: input, shape index: {}]   ;;  %s390_s1 = inlined_call_operand.vmem [shape: f32[2,128], index: 1, kind: input, shape index: {}]   ;;  %s391_s2 = inlined_call_operand.vmem [shape: bf16[128,128], index: 2, kind: output, shape index: {}]  }
   0x1 LB: > { %s284_s10 = sadd.s32 4294967295, %s348_s9   ;;  %p288_p0 = scmp.ge.s32.totalorder %s348_s9, 1  ;;  %s348_s9 = sphi %s365_s9, %s12_s9  }
   0x2   : > { %p113_p1 = scmp.lt.s32.totalorder %s348_s9, 3 }
   0x4   : > { %p114_p2 = pnand %p288_p0, %p113_p1 }
   0x5   : > { %s289_s11 = sshll.u32 (!%p114_p2), %s284_s10, 3 }
   0x6   : > { %117 = sbr.rel (%p114_p2) target bundleno = 29 (0x1d), region = 28  ;;  %p136_p3 = scmp.lt.s32.totalorder (!%p114_p2), %s289_s11, 15 }
   0xb   : > { %v156_v0 = vlaneseq  ;;  %s393_s11 = smov (!%p136_p3, %s289_s11), 15  ;;  %v147_v2 = vld [vmem:[%s390_s1] sm:$0x3] }
   0xc   : > { %s290_s14 = sshll.u32 %s393_s11, 3  ;;  %s292_s18 = sshll.u32 %s393_s11, 2 }
   0xd   : > { %v157_v1 = vshrl.u32 %v156_v0, 7  ;;  %s139_s17 = scalar_lea.vmem %s389_s0, %s290_s14  ;;  %s145_s21 = scalar_lea.vmem %s391_s2, %s292_s18 }
   0xe   : > { %v148_v7 = vld [vmem:[%s139_s17] sm:$0xff]  ;;  %v149_v8 = vld [vmem:[%s139_s17 + $0x8] sm:$0xff]  ;;  %v150_v9 = vld [vmem:[%s139_s17 + $0x10] sm:$0xff] }
   0xf   : > { %v158_v3 = vsub.s32 0, %v157_v1  ;;  %v170_v4 = vsub.s32 1, %v157_v1  ;;  %v151_v12 = vld [vmem:[%s139_s17 + $0x18] sm:$0xff]  ;;  %v152_v14 = vld [vmem:[%s139_s17 + $0x20] sm:$0xff]  ;;  %v153_v15 = vld [vmem:[%s139_s17 + $0x28] sm:$0xff] }
  0x10   : > { %v154_v19 = vld [vmem:[%s139_s17 + $0x30] sm:$0xff]  ;;  %v155_v20 = vld [vmem:[%s139_s17 + $0x38] sm:$0xff] }
  0x11   : > { %v159_v5 = vrot.slane %v147_v2, %v158_v3  ;;  %v171_v6 = vrot.slane %v147_v2, %v170_v4 }
  0x13   : > { %v160_v10 = vmul.f32 %v159_v5, %v148_v7  ;;  %v161_v11 = vmul.f32 %v159_v5, %v149_v8  ;;  %v162_v13 = vmul.f32 %v159_v5, %v150_v9  ;;  %v163_v16 = vmul.f32 %v159_v5, %v151_v12 }
  0x14   : > { %v164_v17 = vmul.f32 %v159_v5, %v152_v14  ;;  %v165_v18 = vmul.f32 %v159_v5, %v153_v15  ;;  %v166_v24 = vmul.f32 %v159_v5, %v154_v19  ;;  %v167_v28 = vmul.f32 %v159_v5, %v155_v20 }
  0x15   : > { %v172_v21 = vadd.f32 %v171_v6, %v160_v10  ;;  %v173_v22 = vadd.f32 %v171_v6, %v161_v11  ;;  %v174_v23 = vadd.f32 %v171_v6, %v162_v13  ;;  %v175_v25 = vadd.f32 %v171_v6, %v163_v16 }
  0x16   : > { %v176_v26 = vadd.f32 %v171_v6, %v164_v17  ;;  %v177_v27 = vadd.f32 %v171_v6, %v165_v18  ;;  %v178_v32 = vadd.f32 %v171_v6, %v166_v24  ;;  %v179_v36 = vadd.f32 %v171_v6, %v167_v28 }
  0x17   : > { %v180_v29 = vmax.f32 %v172_v21, 0.0  ;;  %v181_v30 = vmax.f32 %v173_v22, 0.0  ;;  %v182_v31 = vmax.f32 %v174_v23, 0.0  ;;  %v183_v33 = vmax.f32 %v175_v25, 0.0 }
  0x18   : > { %v184_v34 = vmax.f32 %v176_v26, 0.0  ;;  %v185_v35 = vmax.f32 %v177_v27, 0.0  ;;  %v186_v38 = vmax.f32 %v178_v32, 0.0  ;;  %v187_v41 = vmax.f32 %v179_v36, 0.0 }
  0x19   : > { %v314_v37 = vpack.c.bf16 %v181_v30, %v180_v29  ;;  %v319_v39 = vpack.c.bf16 %v183_v33, %v182_v31 }
  0x1a   : > { %v324_v40 = vpack.c.bf16 %v185_v35, %v184_v34  ;;  %v329_v42 = vpack.c.bf16 %v187_v41, %v186_v38 }
  0x1b   : > { %315 = vst [vmem:[%s145_s21] sm:$0xff] %v314_v37   ;;  %331 = vst [vmem:[%s145_s21 + $0x8] sm:$0xff] %v319_v39  }
  0x1c   : > { %332 = vst [vmem:[%s145_s21 + $0x10] sm:$0xff] %v324_v40   ;;  %333 = vst [vmem:[%s145_s21 + $0x18] sm:$0xff] %v329_v42  }
  0x1d PF: > { %s12_s9 = sadd.s32 1, %s348_s9  }
  0x1e   : > { %p9_p4 = scmp.ge.s32.totalorder %s12_s9, 4  }
  0x20   :  { %11 = sbr.rel (!%p9_p4) target bundleno = 1 (0x1), region = 58 }

// kernel: _lambda_.4
= control target key start
LH: loop header
LB: loop body
LE: loop exit
PB: predicated region body
PF: predicated region fallthrough
CT: control target
= control target key end

     0   :  { %s983_s30 = smov 0   ;;  %s1090_s0 = inlined_call_operand.vmem [shape: bf16[128,36], index: 0, kind: input, shape index: {}]   ;;  %s1091_s1 = inlined_call_operand.vmem [shape: bf16[36,128], index: 1, kind: input, shape index: {}]   ;;  %s1092_s2 = inlined_call_operand.vmem [shape: bf16[128,4], index: 2, kind: input, shape index: {}]   ;;  %s1093_s3 = inlined_call_operand.vmem [shape: bf16[4,128], index: 3, kind: input, shape index: {}]   ;;  %s1094_s4 = inlined_call_operand.vmem [shape: f32[128,128], index: 4, kind: output, shape index: {0}]   ;;  %s1095_s5 = inlined_call_operand.vmem [shape: f32[128,128], index: 5, kind: output, shape index: {1}]   ;;  %s1096_s6 = inlined_call_operand.vmem [shape: f32[1,128], index: 6, kind: output, shape index: {2}]   ;;  %s1097_s7 = inlined_call_operand.vmem [shape: f32[1,128], index: 7, kind: output, shape index: {3}]   ;;  %s1098_s8 = inlined_call_operand.vmem [shape: f32[1,128], index: 8, kind: output, shape index: {4}]   ;;  %s1099_s9 = inlined_call_operand.vmem [shape: f32[1,128], index: 9, kind: output, shape index: {5}]  }
   0x1 LB: > { %s831_s10 = sadd.s32 4294967295, %s930_s30   ;;  %p835_p0 = scmp.ge.s32.totalorder %s930_s30, 1  ;;  %s930_s30 = sphi %s983_s30, %s20_s30  }
   0x2   : > { %p290_p1 = scmp.lt.s32.totalorder %s930_s30, 3 }
   0x4   : > { %p291_p2 = pnand %p835_p0, %p290_p1 }
   0x5   : > { %s836_s11 = sshll.u32 (!%p291_p2), %s831_s10, 3  ;;  %p844_p4 = scmp.ne.s32.totalorder (!%p291_p2), %s831_s10, 0 }
   0x6   : > { %294 = sbr.rel (%p291_p2) target bundleno = 263 (0x107), region = 36  ;;  %p337_p3 = scmp.lt.s32.totalorder (!%p291_p2), %s836_s11, 15 }
   0xb   : > { %s1101_s11 = smov (!%p337_p3, %s836_s11), 15  ;;  %364 = sbr.rel (%p844_p4) target bundleno = 19 (0x13), region = 40 }
   0xc   : > { %s837_s12 = sshll.u32 %s1101_s11, 2  ;;  %s841_s13 = sshll.u32 %s1101_s11, 3 }
   0xd   : > { %s994_s16 = scalar_lea.vmem %s1090_s0, %s837_s12  ;;  %s999_s19 = scalar_lea.vmem %s1092_s2, %s837_s12 }
   0xe   : > { %s1004_s22 = scalar_lea.vmem %s1094_s4, %s841_s13  ;;  %s1009_s25 = scalar_lea.vmem %s1095_s5, %s841_s13 }
  0x10   : > { %v932_v0 = vmov 0.0  }
  0x11   : > { %365 = vst [vmem:[%s1096_s6] sm:$0x1] %v932_v0  ;;  %366 = vst [vmem:[%s1097_s7] sm:$0x1] %v932_v0 }
  0x12   : > { %367 = vst [vmem:[%s1098_s8] sm:$0x1] %v932_v0  ;;  %368 = vst [vmem:[%s1099_s9] sm:$0x1] %v932_v0 }
  0x13 PF: > { %vm430_vm0 = vcmask 1041408   ;;  %v507_v1 = vld [vmem:[%s1093_s3] sm:$0x3]  ;;  %v913_v4 = vld [vmem:[%s1091_s1 + $0x10] ss:$0 sps:$4 sm:$0x33]  }
  0x14   : > { %v914_v2 = vld [vmem:[%s999_s19] sm:$0xff]   ;;  %903 = vmatprep.subr.msk.bf16.mxu1 %vm430_vm0, %v507_v1  ;;  %v542_v3 = vsel %vm430_vm0, %v507_v1, 0  ;;  %vm528_vm1 = vcmask 31744   ;;  %v915_v5 = vld [vmem:[%s999_s19 + $0x8] sm:$0xff]   ;;  %902 = vmatprep.subr.msk.bf16.mxu0 %vm430_vm0, %v913_v4  ;;  %v432_v6 = vsel %vm430_vm0, %v913_v4, 0  ;;  %v918_v9 = vld [vmem:[%s999_s19 + $0x10] sm:$0xff]  }
  0x15   : > { %893 = vmatpush3.bf16.msra.mxu1 %v542_v3  ;;  %894 = vmatprep.mubr.msk.bf16.mxu1 %vm528_vm1, %v914_v2  ;;  %v916_v7 = vld [vmem:[%s1091_s1 + $0x8] sm:$0xff]   ;;  %v917_v8 = vld [vmem:[%s1091_s1] sm:$0xff]   ;;  %vm417_vm2 = vcmask 293888   ;;  %v919_v11 = vld [vmem:[%s999_s19 + $0x18] sm:$0xff]  }
  0x16   : > { %879 = vmatpush3.bf16.msra.mxu0 %v432_v6  ;;  %v920_v10 = vld [vmem:[%s994_s16] sm:$0xff]   ;;  %v921_v12 = vld [vmem:[%s994_s16 + $0x8] sm:$0xff]   ;;  %v922_v13 = vld [vmem:[%s994_s16 + $0x10] sm:$0xff]  }
  0x17   : > { %880 = vmatprep.subr.bf16.mxu0 %v916_v7  ;;  %884 = vmatprep.mubr.msk.bf16.mxu0 %vm417_vm2, %v920_v10  ;;  %v923_v14 = vld [vmem:[%s994_s16 + $0x18] sm:$0xff]  }
  0x18   : > { %895 = vmatmul.mubr.msk.bf16.vlgmr.msra.gmra.mxu1 %vm528_vm1, %v915_v5 }
  0x19   : > { %898 = vmatprep.mubr.msk.bf16.mxu1 %vm528_vm1, %v918_v9 }
  0x1a   : > { %881 = vmatpush3.bf16.msra.mxu0 %v916_v7 }
  0x1b   : > { %882 = vmatprep.subr.bf16.mxu0 %v917_v8 }
  0x1e   : > { %883 = vmatpush3.bf16.msra.mxu0 %v917_v8 }
  0x20   : > { %899 = vmatmul.mubr.msk.bf16.gmra.mxu1 %vm528_vm1, %v919_v11 }
  0x21   : > { %885 = vmatmul.mubr.msk.bf16.vlgmr.msra.gmra.mxu0 %vm417_vm2, %v921_v12 }
  0x22   : > { %888 = vmatprep.mubr.msk.bf16.mxu0 %vm417_vm2, %v922_v13 }
  0x29   : > { %889 = vmatmul.mubr.msk.bf16.gmra.mxu0 %vm417_vm2, %v923_v14 }
  0xd8   : > { %v896_v15 = vpop.f32.mrf.mxu1 }
  0xd9   : > { %619 = vst [vmem:[%s1009_s25 + $0x10] sm:$0xff] %v896_v15  ;;  %v684_v20 = vmul.f32 %v896_v15, %v896_v15 }
  0xda   : > { %v578_v16 = vpop.f32.mrf.mxu1 }
  0xdb   : > { %617 = vst [vmem:[%s1009_s25] sm:$0xff] %v578_v16  ;;  %v682_v18 = vmul.f32 %v578_v16, %v578_v16 }
  0xdc   : > { %v897_v17 = vpop.f32.mrf.mxu1 }
  0xdd   : > { %620 = vst [vmem:[%s1009_s25 + $0x18] sm:$0xff] %v897_v17  ;;  %v685_v24 = vmul.f32 %v897_v17, %v897_v17 }
  0xde   : > { %v581_v19 = vpop.f32.mrf.mxu1 }
  0xdf   : > { %618 = vst [vmem:[%s1009_s25 + $0x8] sm:$0xff] %v581_v19  ;;  %v666_v21 = vadd.f32 %v581_v19, %v578_v16  ;;  %v683_v22 = vmul.f32 %v581_v19, %v581_v19 }
  0xe0   : > { %v900_v23 = vpop.f32.mrf.mxu1 }
  0xe1   : > { %v667_v25 = vadd.f32 %v896_v15, %v666_v21  ;;  %v690_v26 = vadd.f32 %v683_v22, %v682_v18  ;;  %623 = vst [vmem:[%s1009_s25 + $0x30] sm:$0xff] %v900_v23  ;;  %v886_v27 = vpop.f32.mrf.mxu0  ;;  %v688_v38 = vmul.f32 %v900_v23, %v900_v23 }
  0xe2   : > { %v594_v28 = vpop.f32.mrf.mxu1  ;;  %611 = vst [vmem:[%s1004_s22 + $0x10] sm:$0xff] %v886_v27  ;;  %v644_v49 = vmul.f32 %v886_v27, %v886_v27 }
  0xe3   : > { %v691_v29 = vadd.f32 %v690_v26, %v684_v20  ;;  %621 = vst [vmem:[%s1009_s25 + $0x20] sm:$0xff] %v594_v28  ;;  %v668_v30 = vadd.f32 %v897_v17, %v667_v25  ;;  %v686_v31 = vmul.f32 %v594_v28, %v594_v28  ;;  %v468_v32 = vpop.f32.mrf.mxu0  ;;  %v665_v17 = vld [vmem:[%s1098_s8] sm:$0x1] }
  0xe4   : > { %v901_v33 = vpop.f32.mrf.mxu1  ;;  %609 = vst [vmem:[%s1004_s22] sm:$0xff] %v468_v32  ;;  %v642_v42 = vmul.f32 %v468_v32, %v468_v32 }
  0xe5   : > { %v669_v34 = vadd.f32 %v668_v30, %v594_v28  ;;  %v692_v35 = vadd.f32 %v691_v29, %v685_v24  ;;  %624 = vst [vmem:[%s1009_s25 + $0x38] sm:$0xff] %v901_v33  ;;  %v887_v36 = vpop.f32.mrf.mxu0  ;;  %v689_v43 = vmul.f32 %v901_v33, %v901_v33 }
  0xe6   : > { %v597_v37 = vpop.f32.mrf.mxu1  ;;  %612 = vst [vmem:[%s1004_s22 + $0x18] sm:$0xff] %v887_v36  ;;  %v645_v55 = vmul.f32 %v887_v36, %v887_v36 }
  0xe7   : > { %v693_v39 = vadd.f32 %v692_v35, %v686_v31  ;;  %622 = vst [vmem:[%s1009_s25 + $0x28] sm:$0xff] %v597_v37  ;;  %v670_v40 = vadd.f32 %v669_v34, %v597_v37  ;;  %v687_v41 = vmul.f32 %v597_v37, %v597_v37  ;;  %v471_v44 = vpop.f32.mrf.mxu0  ;;  %v625_v35 = vld [vmem:[%s1096_s6] sm:$0x1] }
  0xe8   : > { %610 = vst [vmem:[%s1004_s22 + $0x8] sm:$0xff] %v471_v44  ;;  %v626_v47 = vadd.f32 %v471_v44, %v468_v32  ;;  %v643_v48 = vmul.f32 %v471_v44, %v471_v44 }
  0xe9   : > { %v671_v45 = vadd.f32 %v900_v23, %v670_v40  ;;  %v694_v46 = vadd.f32 %v693_v39, %v687_v41  ;;  %v890_v50 = vpop.f32.mrf.mxu0  ;;  %v681_v23 = vld [vmem:[%s1099_s9] sm:$0x1] }
  0xea   : > { %v627_v53 = vadd.f32 %v886_v27, %v626_v47  ;;  %v650_v54 = vadd.f32 %v643_v48, %v642_v42  ;;  %615 = vst [vmem:[%s1004_s22 + $0x30] sm:$0xff] %v890_v50  ;;  %v648_v12 = vmul.f32 %v890_v50, %v890_v50  ;;  %v641_v40 = vld [vmem:[%s1097_s7] sm:$0x1] }
  0xeb   : > { %v672_v51 = vadd.f32 %v901_v33, %v671_v45  ;;  %v695_v52 = vadd.f32 %v694_v46, %v688_v38  ;;  %v484_v56 = vpop.f32.mrf.mxu0 }
  0xec   : > { %v651_v59 = vadd.f32 %v650_v54, %v644_v49  ;;  %613 = vst [vmem:[%s1004_s22 + $0x20] sm:$0xff] %v484_v56  ;;  %v628_v60 = vadd.f32 %v887_v36, %v627_v53  ;;  %v646_v61 = vmul.f32 %v484_v56, %v484_v56 }
  0xed   : > { %v673_v57 = vrot.slane %v672_v51, 4  ;;  %v696_v58 = vadd.f32 %v695_v52, %v689_v43  ;;  %v891_v62 = vpop.f32.mrf.mxu0 }
  0xee   : > { %v629_v1 = vadd.f32 %v628_v60, %v484_v56  ;;  %v652_v2 = vadd.f32 %v651_v59, %v645_v55  ;;  %616 = vst [vmem:[%s1004_s22 + $0x38] sm:$0xff] %v891_v62  ;;  %v649_v18 = vmul.f32 %v891_v62, %v891_v62 }
  0xef   : > { %v674_v63 = vadd.f32 %v673_v57, %v672_v51  ;;  %v697_v0 = vrot.slane %v696_v58, 4  ;;  %v487_v3 = vpop.f32.mrf.mxu0 }
  0xf0   : > { %v653_v6 = vadd.f32 %v652_v2, %v646_v61  ;;  %614 = vst [vmem:[%s1004_s22 + $0x28] sm:$0xff] %v487_v3  ;;  %v630_v7 = vadd.f32 %v629_v1, %v487_v3  ;;  %v647_v8 = vmul.f32 %v487_v3, %v487_v3 }
  0xf1   : > { %v675_v4 = vrot.slane %v674_v63, 2  ;;  %v698_v5 = vadd.f32 %v697_v0, %v696_v58 }
  0xf2   : > { %v631_v11 = vadd.f32 %v890_v50, %v630_v7  ;;  %v654_v13 = vadd.f32 %v653_v6, %v647_v8 }
  0xf3   : > { %v676_v9 = vadd.f32 %v675_v4, %v674_v63  ;;  %v699_v10 = vrot.slane %v698_v5, 2 }
  0xf4   : > { %v632_v16 = vadd.f32 %v891_v62, %v631_v11  ;;  %v655_v19 = vadd.f32 %v654_v13, %v648_v12 }
  0xf5   : > { %v677_v14 = vrot.slane %v676_v9, 1  ;;  %v700_v15 = vadd.f32 %v699_v10, %v698_v5 }
  0xf6   : > { %v633_v22 = vrot.slane %v632_v16, 4  ;;  %v656_v24 = vadd.f32 %v655_v19, %v649_v18 }
  0xf7   : > { %v678_v20 = vadd.f32 %v677_v14, %v676_v9  ;;  %v701_v21 = vrot.slane %v700_v15, 1 }
  0xf8   : > { %v634_v27 = vadd.f32 %v633_v22, %v632_v16  ;;  %v657_v28 = vrot.slane %v656_v24, 4 }
  0xf9   : > { %v679_v25 = vadd.f32 %v678_v20, %v665_v17  ;;  %v702_v26 = vadd.f32 %v701_v21, %v700_v15 }
  0xfa   : > { %v635_v30 = vrot.slane %v634_v27, 2  ;;  %v658_v31 = vadd.f32 %v657_v28, %v656_v24 }
  0xfb   : > { %680 = vst [vmem:[%s1098_s8] sm:$0x1] %v679_v25  ;;  %v703_v29 = vadd.f32 %v702_v26, %v681_v23 }
  0xfc   : > { %v636_v32 = vadd.f32 %v635_v30, %v634_v27  ;;  %v659_v33 = vrot.slane %v658_v31, 2 }
  0xfd   : > { %704 = vst [vmem:[%s1099_s9] sm:$0x1] %v703_v29 }
  0xfe   : > { %v637_v34 = vrot.slane %v636_v32, 1  ;;  %v660_v36 = vadd.f32 %v659_v33, %v658_v31 }
 0x100   : > { %v638_v37 = vadd.f32 %v637_v34, %v636_v32  ;;  %v661_v38 = vrot.slane %v660_v36, 1 }
 0x102   : > { %v639_v39 = vadd.f32 %v638_v37, %v625_v35  ;;  %v662_v41 = vadd.f32 %v661_v38, %v660_v36 }
 0x104   : > { %640 = vst [vmem:[%s1096_s6] sm:$0x1] %v639_v39  ;;  %v663_v42 = vadd.f32 %v662_v41, %v641_v40 }
 0x106   : > { %664 = vst [vmem:[%s1097_s7] sm:$0x1] %v663_v42 }
 0x107 PF: > { %s20_s30 = sadd.s32 1, %s930_s30  }
 0x108   : > { %p17_p5 = scmp.ge.s32.totalorder %s20_s30, 4  }
 0x10a   :  { %19 = sbr.rel (!%p17_p5) target bundleno = 1 (0x1), region = 117 }

// kernel: _lambda_.7
= control target key start
LH: loop header
LB: loop body
LE: loop exit
PB: predicated region body
PF: predicated region fallthrough
CT: control target
= control target key end

     0   :  { %s390_s12 = smov 0   ;;  %s448_s0 = inlined_call_operand.vmem [shape: f32[128,128], index: 0, kind: input, shape index: {}]   ;;  %s449_s1 = inlined_call_operand.vmem [shape: f32[128,128], index: 1, kind: input, shape index: {}]   ;;  %s450_s2 = inlined_call_operand.vmem [shape: f32[4,128], index: 2, kind: input, shape index: {}]   ;;  %s451_s3 = inlined_call_operand.vmem [shape: f32[128,128], index: 3, kind: output, shape index: {}]  }
   0x1 LB: > { %s341_s13 = sadd.s32 4294967295, %s368_s12   ;;  %p345_p0 = scmp.ge.s32.totalorder %s368_s12, 1  ;;  %s368_s12 = sphi %s390_s12, %s13_s12  }
   0x2   : > { %p149_p1 = scmp.lt.s32.totalorder %s368_s12, 3 }
   0x4   : > { %p150_p2 = pnand %p345_p0, %p149_p1 }
   0x5   : > { %s346_s14 = sshll.u32 (!%p150_p2), %s341_s13, 3 }
   0x6   : > { %153 = sbr.rel (%p150_p2) target bundleno = 36 (0x24), region = 32  ;;  %p179_p3 = scmp.lt.s32.totalorder (!%p150_p2), %s346_s14, 15 }
   0xb   : > { %v205_v0 = vlaneseq  ;;  %s453_s14 = smov (!%p179_p3, %s346_s14), 15  ;;  %v196_v2 = vld [vmem:[%s450_s2] sm:$0xf] }
   0xc   : > { %s401_s17 = sshll.u32 %s453_s14, 3 }
   0xd   : > { %v206_v1 = vshrl.u32 %v205_v0, 7  ;;  %s407_s20 = scalar_lea.vmem %s448_s0, %s401_s17  ;;  %s413_s23 = scalar_lea.vmem %s449_s1, %s401_s17 }
   0xe   : > { %v197_v8 = vld [vmem:[%s407_s20] sm:$0xff]  ;;  %v198_v10 = vld [vmem:[%s407_s20 + $0x8] sm:$0xff]  ;;  %v199_v16 = vld [vmem:[%s407_s20 + $0x10] sm:$0xff]  ;;  %s434_s26 = scalar_lea.vmem %s451_s3, %s401_s17 }
   0xf   : > { %v207_v3 = vsub.s32 0, %v206_v1  ;;  %v227_v4 = vsub.s32 1, %v206_v1  ;;  %v247_v5 = vsub.s32 2, %v206_v1  ;;  %v217_v9 = vld [vmem:[%s413_s23] sm:$0xff]  ;;  %v218_v15 = vld [vmem:[%s413_s23 + $0x8] sm:$0xff]  ;;  %v219_v17 = vld [vmem:[%s413_s23 + $0x10] sm:$0xff] }
  0x10   : > { %v200_v21 = vld [vmem:[%s407_s20 + $0x18] sm:$0xff]  ;;  %v201_v23 = vld [vmem:[%s407_s20 + $0x20] sm:$0xff]  ;;  %v202_v29 = vld [vmem:[%s407_s20 + $0x28] sm:$0xff] }
  0x11   : > { %v208_v6 = vrot.slane %v196_v2, %v207_v3  ;;  %v228_v7 = vrot.slane %v196_v2, %v227_v4  ;;  %v248_v13 = vrot.slane %v196_v2, %v247_v5  ;;  %v220_v22 = vld [vmem:[%s413_s23 + $0x18] sm:$0xff]  ;;  %v221_v28 = vld [vmem:[%s413_s23 + $0x20] sm:$0xff]  ;;  %v222_v30 = vld [vmem:[%s413_s23 + $0x28] sm:$0xff] }
  0x12   : > { %v203_v35 = vld [vmem:[%s407_s20 + $0x30] sm:$0xff]  ;;  %v204_v37 = vld [vmem:[%s407_s20 + $0x38] sm:$0xff] }
  0x13   : > { %v209_v11 = vmul.f32 %v208_v6, %v197_v8  ;;  %v229_v12 = vmul.f32 %v228_v7, %v217_v9  ;;  %v210_v14 = vmul.f32 %v208_v6, %v198_v10  ;;  %v230_v18 = vmul.f32 %v228_v7, %v218_v15  ;;  %v223_v36 = vld [vmem:[%s413_s23 + $0x30] sm:$0xff]  ;;  %v224_v46 = vld [vmem:[%s413_s23 + $0x38] sm:$0xff] }
  0x14   : > { %v211_v19 = vmul.f32 %v208_v6, %v199_v16  ;;  %v231_v20 = vmul.f32 %v228_v7, %v219_v17  ;;  %v212_v25 = vmul.f32 %v208_v6, %v200_v21  ;;  %v232_v26 = vmul.f32 %v228_v7, %v220_v22 }
  0x15   : > { %v237_v24 = vadd.f32 %v229_v12, %v209_v11  ;;  %v213_v27 = vmul.f32 %v208_v6, %v201_v23  ;;  %v238_v31 = vadd.f32 %v230_v18, %v210_v14  ;;  %v233_v33 = vmul.f32 %v228_v7, %v221_v28 }
  0x16   : > { %v239_v32 = vadd.f32 %v231_v20, %v211_v19  ;;  %v214_v34 = vmul.f32 %v208_v6, %v202_v29  ;;  %v240_v39 = vadd.f32 %v232_v26, %v212_v25  ;;  %v234_v40 = vmul.f32 %v228_v7, %v222_v30 }
  0x17   : > { %v249_v38 = vadd.f32 %v248_v13, %v237_v24  ;;  %v215_v41 = vmul.f32 %v208_v6, %v203_v35  ;;  %v250_v42 = vadd.f32 %v248_v13, %v238_v31  ;;  %v241_v44 = vadd.f32 %v233_v33, %v213_v27 }
  0x18   : > { %v251_v43 = vadd.f32 %v248_v13, %v239_v32  ;;  %v235_v45 = vmul.f32 %v228_v7, %v223_v36  ;;  %v252_v48 = vadd.f32 %v248_v13, %v240_v39  ;;  %v242_v49 = vadd.f32 %v234_v40, %v214_v34 }
  0x19   : > { %v257_v47 = vmax.f32 %v249_v38, 0.0  ;;  %v216_v50 = vmul.f32 %v208_v6, %v204_v37  ;;  %v258_v51 = vmax.f32 %v250_v42, 0.0  ;;  %v253_v53 = vadd.f32 %v248_v13, %v241_v44 }
  0x1a   : > { %v259_v52 = vmax.f32 %v251_v43, 0.0  ;;  %v243_v54 = vadd.f32 %v235_v45, %v215_v41  ;;  %v260_v55 = vmax.f32 %v252_v48, 0.0  ;;  %v254_v56 = vadd.f32 %v248_v13, %v242_v49 }
  0x1b   : > { %265 = vst [vmem:[%s434_s26] sm:$0xff] %v257_v47  ;;  %v236_v57 = vmul.f32 %v228_v7, %v224_v46  ;;  %266 = vst [vmem:[%s434_s26 + $0x8] sm:$0xff] %v258_v51  ;;  %v261_v58 = vmax.f32 %v253_v53, 0.0 }
  0x1c   : > { %267 = vst [vmem:[%s434_s26 + $0x10] sm:$0xff] %v259_v52  ;;  %v255_v59 = vadd.f32 %v248_v13, %v243_v54  ;;  %268 = vst [vmem:[%s434_s26 + $0x18] sm:$0xff] %v260_v55  ;;  %v262_v60 = vmax.f32 %v254_v56, 0.0 }
  0x1d   : > { %v244_v61 = vadd.f32 %v236_v57, %v216_v50  ;;  %269 = vst [vmem:[%s434_s26 + $0x20] sm:$0xff] %v261_v58 }
  0x1e   : > { %v263_v62 = vmax.f32 %v255_v59, 0.0  ;;  %270 = vst [vmem:[%s434_s26 + $0x28] sm:$0xff] %v262_v60 }
  0x1f   : > { %v256_v63 = vadd.f32 %v248_v13, %v244_v61 }
  0x20   : > { %271 = vst [vmem:[%s434_s26 + $0x30] sm:$0xff] %v263_v62 }
  0x21   : > { %v264_v0 = vmax.f32 %v256_v63, 0.0 }
  0x23   : > { %272 = vst [vmem:[%s434_s26 + $0x38] sm:$0xff] %v264_v0 }
  0x24 PF: > { %s13_s12 = sadd.s32 1, %s368_s12  }
  0x25   : > { %p10_p4 = scmp.ge.s32.totalorder %s13_s12, 4  }
  0x27   :  { %12 = sbr.rel (!%p10_p4) target bundleno = 1 (0x1), region = 65 }

// kernel: _lambda_.6
= control target key start
LH: loop header
LB: loop body
LE: loop exit
PB: predicated region body
PF: predicated region fallthrough
CT: control target
= control target key end

     0   :  { %s581_s15 = smov 0   ;;  %s651_s0 = inlined_call_operand.vmem [shape: bf16[128,72], index: 0, kind: input, shape index: {}]   ;;  %s652_s1 = inlined_call_operand.vmem [shape: bf16[72,128], index: 1, kind: input, shape index: {}]   ;;  %s653_s2 = inlined_call_operand.vmem [shape: f32[128,128], index: 2, kind: output, shape index: {0}]   ;;  %s654_s3 = inlined_call_operand.vmem [shape: f32[1,128], index: 3, kind: output, shape index: {1}]   ;;  %s655_s4 = inlined_call_operand.vmem [shape: f32[1,128], index: 4, kind: output, shape index: {2}]  }
   0x1 LB: > { %s465_s16 = sadd.s32 4294967295, %s553_s15   ;;  %p469_p0 = scmp.ge.s32.totalorder %s553_s15, 1  ;;  %s553_s15 = sphi %s581_s15, %s15_s15  }
   0x2   : > { %p158_p1 = scmp.lt.s32.totalorder %s553_s15, 3 }
   0x4   : > { %p159_p2 = pnand %p469_p0, %p158_p1 }
   0x5   : > { %s470_s17 = sshll.u32 (!%p159_p2), %s465_s16, 3  ;;  %p474_p4 = scmp.ne.s32.totalorder (!%p159_p2), %s465_s16, 0 }
   0x6   : > { %162 = sbr.rel (%p159_p2) target bundleno = 269 (0x10d), region = 28  ;;  %p185_p3 = scmp.lt.s32.totalorder (!%p159_p2), %s470_s17, 15 }
   0xb   : > { %s657_s17 = smov (!%p185_p3, %s470_s17), 15  ;;  %200 = sbr.rel (%p474_p4) target bundleno = 18 (0x12), region = 32 }
   0xc   : > { %s471_s18 = sshll.u32 %s657_s17, 2  ;;  %s473_s19 = sshll.u32 %s657_s17, 3 }
   0xd   : > { %s592_s22 = scalar_lea.vmem %s651_s0, %s471_s18  ;;  %s597_s25 = scalar_lea.vmem %s653_s2, %s473_s19 }
  0x10   : > { %v555_v0 = vmov 0.0  }
  0x11   : > { %201 = vst [vmem:[%s654_s3] sm:$0x1] %v555_v0  ;;  %202 = vst [vmem:[%s655_s4] sm:$0x1] %v555_v0 }
  0x12 PF: > { %v538_v1 = vld [vmem:[%s652_s1 + $0x20] ss:$0 sps:$4 sm:$0xff]   ;;  %vm280_vm0 = vcmask 1043456   ;;  %v539_v2 = vld [vmem:[%s652_s1 + $0x18] sm:$0xff]   ;;  %v540_v4 = vld [vmem:[%s652_s1 + $0x10] sm:$0xff]   ;;  %vm267_vm1 = vcmask 588800  }
  0x13   : > { %527 = vmatprep.subr.msk.bf16.mxu0 %vm280_vm0, %v538_v1  ;;  %v282_v3 = vsel %vm280_vm0, %v538_v1, 0  ;;  %528 = vmatprep.subr.msk.bf16.mxu1 %vm280_vm0, %v538_v1  ;;  %v543_v5 = vld [vmem:[%s592_s22] sm:$0xff]   ;;  %v545_v6 = vld [vmem:[%s592_s22 + $0x10] sm:$0xff]   ;;  %v541_v7 = vld [vmem:[%s652_s1 + $0x8] sm:$0xff]  }
  0x14   : > { %500 = vmatpush3.bf16.msra.mxu0 %v282_v3  ;;  %522 = vmatpush3.bf16.msra.mxu1 %v282_v3  ;;  %v542_v8 = vld [vmem:[%s652_s1] sm:$0xff]   ;;  %v544_v9 = vld [vmem:[%s592_s22 + $0x8] sm:$0xff]   ;;  %v546_v10 = vld [vmem:[%s592_s22 + $0x18] sm:$0xff]  }
  0x15   : > { %501 = vmatprep.subr.bf16.mxu0 %v539_v2  ;;  %518 = vmatprep.subr.bf16.mxu1 %v539_v2 }
  0x16   : > { %509 = vmatprep.mubr.msk.bf16.mxu0 %vm267_vm1, %v543_v5  ;;  %513 = vmatprep.mubr.msk.bf16.mxu1 %vm267_vm1, %v545_v6 }
  0x18   : > { %502 = vmatpush3.bf16.msra.mxu0 %v539_v2  ;;  %523 = vmatpush3.bf16.msra.mxu1 %v539_v2  ;;  %v357_v50 = vld [vmem:[%s654_s3] sm:$0x1] }
  0x19   : > { %503 = vmatprep.subr.bf16.mxu0 %v540_v4  ;;  %519 = vmatprep.subr.bf16.mxu1 %v540_v4  ;;  %v373_v53 = vld [vmem:[%s655_s4] sm:$0x1] }
  0x1c   : > { %504 = vmatpush3.bf16.msra.mxu0 %v540_v4  ;;  %524 = vmatpush3.bf16.msra.mxu1 %v540_v4 }
  0x1d   : > { %505 = vmatprep.subr.bf16.mxu0 %v541_v7  ;;  %520 = vmatprep.subr.bf16.mxu1 %v541_v7 }
  0x20   : > { %506 = vmatpush3.bf16.msra.mxu0 %v541_v7  ;;  %525 = vmatpush3.bf16.msra.mxu1 %v541_v7 }
  0x21   : > { %507 = vmatprep.subr.bf16.mxu0 %v542_v8  ;;  %521 = vmatprep.subr.bf16.mxu1 %v542_v8 }
  0x24   : > { %508 = vmatpush3.bf16.msra.mxu0 %v542_v8  ;;  %526 = vmatpush3.bf16.msra.mxu1 %v542_v8 }
  0x27   : > { %510 = vmatmul.mubr.msk.bf16.vlgmr.msra.gmra.mxu0 %vm267_vm1, %v544_v9  ;;  %514 = vmatmul.mubr.msk.bf16.vlgmr.msra.gmra.mxu1 %vm267_vm1, %v546_v10 }
  0xe7   : > { %v511_v11 = vpop.f32.mrf.mxu0  ;;  %v515_v12 = vpop.f32.mrf.mxu1 }
  0xe8   : > { %351 = vst [vmem:[%s597_s25 + $0x10] sm:$0xff] %v511_v11  ;;  %355 = vst [vmem:[%s597_s25 + $0x30] sm:$0xff] %v515_v12  ;;  %v376_v22 = vmul.f32 %v511_v11, %v511_v11  ;;  %v380_v34 = vmul.f32 %v515_v12, %v515_v12 }
  0xe9   : > { %v318_v13 = vpop.f32.mrf.mxu0  ;;  %v334_v14 = vpop.f32.mrf.mxu1 }
  0xea   : > { %349 = vst [vmem:[%s597_s25] sm:$0xff] %v318_v13  ;;  %353 = vst [vmem:[%s597_s25 + $0x20] sm:$0xff] %v334_v14  ;;  %v374_v19 = vmul.f32 %v318_v13, %v318_v13  ;;  %v378_v28 = vmul.f32 %v334_v14, %v334_v14 }
  0xeb   : > { %v512_v15 = vpop.f32.mrf.mxu0  ;;  %v516_v16 = vpop.f32.mrf.mxu1 }
  0xec   : > { %352 = vst [vmem:[%s597_s25 + $0x18] sm:$0xff] %v512_v15  ;;  %356 = vst [vmem:[%s597_s25 + $0x38] sm:$0xff] %v516_v16  ;;  %v377_v25 = vmul.f32 %v512_v15, %v512_v15  ;;  %v381_v37 = vmul.f32 %v516_v16, %v516_v16 }
  0xed   : > { %v321_v17 = vpop.f32.mrf.mxu0  ;;  %v337_v18 = vpop.f32.mrf.mxu1 }
  0xee   : > { %350 = vst [vmem:[%s597_s25 + $0x8] sm:$0xff] %v321_v17  ;;  %v358_v20 = vadd.f32 %v321_v17, %v318_v13  ;;  %v375_v21 = vmul.f32 %v321_v17, %v321_v17  ;;  %354 = vst [vmem:[%s597_s25 + $0x28] sm:$0xff] %v337_v18  ;;  %v379_v32 = vmul.f32 %v337_v18, %v337_v18 }
  0xf0   : > { %v359_v23 = vadd.f32 %v511_v11, %v358_v20  ;;  %v382_v24 = vadd.f32 %v375_v21, %v374_v19 }
  0xf2   : > { %v383_v26 = vadd.f32 %v382_v24, %v376_v22  ;;  %v360_v27 = vadd.f32 %v512_v15, %v359_v23 }
  0xf4   : > { %v361_v29 = vadd.f32 %v360_v27, %v334_v14  ;;  %v384_v30 = vadd.f32 %v383_v26, %v377_v25 }
  0xf6   : > { %v362_v31 = vadd.f32 %v361_v29, %v337_v18  ;;  %v385_v33 = vadd.f32 %v384_v30, %v378_v28 }
  0xf8   : > { %v363_v35 = vadd.f32 %v515_v12, %v362_v31  ;;  %v386_v36 = vadd.f32 %v385_v33, %v379_v32 }
  0xfa   : > { %v364_v38 = vadd.f32 %v516_v16, %v363_v35  ;;  %v387_v39 = vadd.f32 %v386_v36, %v380_v34 }
  0xfc   : > { %v365_v40 = vrot.slane %v364_v38, 4  ;;  %v388_v41 = vadd.f32 %v387_v39, %v381_v37 }
  0xfe   : > { %v366_v42 = vadd.f32 %v365_v40, %v364_v38  ;;  %v389_v43 = vrot.slane %v388_v41, 4 }
 0x100   : > { %v367_v44 = vrot.slane %v366_v42, 2  ;;  %v390_v45 = vadd.f32 %v389_v43, %v388_v41 }
 0x102   : > { %v368_v46 = vadd.f32 %v367_v44, %v366_v42  ;;  %v391_v47 = vrot.slane %v390_v45, 2 }
 0x104   : > { %v369_v48 = vrot.slane %v368_v46, 1  ;;  %v392_v49 = vadd.f32 %v391_v47, %v390_v45 }
 0x106   : > { %v370_v51 = vadd.f32 %v369_v48, %v368_v46  ;;  %v393_v52 = vrot.slane %v392_v49, 1 }
 0x108   : > { %v371_v54 = vadd.f32 %v370_v51, %v357_v50  ;;  %v394_v55 = vadd.f32 %v393_v52, %v392_v49 }
 0x10a   : > { %372 = vst [vmem:[%s654_s3] sm:$0x1] %v371_v54  ;;  %v395_v56 = vadd.f32 %v394_v55, %v373_v53 }
 0x10c   : > { %396 = vst [vmem:[%s655_s4] sm:$0x1] %v395_v56 }
 0x10d PF: > { %s15_s15 = sadd.s32 1, %s553_s15  }
 0x10e   : > { %p12_p5 = scmp.ge.s32.totalorder %s15_s15, 4  }
 0x110   :  { %14 = sbr.rel (!%p12_p5) target bundleno = 1 (0x1), region = 78 }

</bundles_post_ra>
